<compile_context>
chip_gen: v7x
topology: tpu7x:2x2x1
jax: 0.10.0
libtpu: 0.0.40
codegen_flags: <defaults>
</compile_context>

<pallas_src>
import jax
import jax.numpy as jnp
from jax import lax
from jax.experimental import pallas as pl
from jax.experimental.pallas import tpu as pltpu


def _mha_kernel(xqkv_ref, wqkv_ref, bqkv_ref, mask_ref, wm_ref, bm_ref, o_ref):
    C = o_ref.shape[0]          # channels (d_model); pixels N = o_ref.shape[1]

    # Fused q/k/v projection: one block-diagonal bf16 matmul over the flattened
    # pixel axis (single MXU pass, K=3C), f32 accumulation, f32 bias add.
    qkv = jnp.dot(wqkv_ref[...], xqkv_ref[...],
                  preferred_element_type=jnp.float32) + bqkv_ref[...]
    # Static ref-result slices; 1/sqrt(d_model) already folded into wq/bq.
    q = qkv[0 * C:1 * C, :].astype(jnp.bfloat16)
    k = qkv[1 * C:2 * C, :].astype(jnp.bfloat16)
    v = qkv[2 * C:3 * C, :].astype(jnp.bfloat16)

    # scores_T[m, n] = sum_c k[c, m] * q[c, n]  -- transposed orientation so the
    # PV matmul below is a fully natural (C, M) x (M, N) dot (no prob transpose).
    scores = lax.dot_general(k, q, (((0,), (0,)), ((), ())),
                             preferred_element_type=jnp.float32)

    # Resident additive mask: 0 where pixels share a height row, -1e30 elsewhere
    # (symmetric, so the transposed orientation uses the same array).  This
    # reproduces the per-row softmax exactly while keeping every matmul and
    # store 128 lanes wide.
    scores = scores + mask_ref[...]

    # Numerically stable softmax over m (axis 0 of the transposed scores).
    # Every column has 16 unmasked entries, so denom >= 1 (no 0/0 with the
    # approximate reciprocal).
    scores = scores - jnp.max(scores, axis=0, keepdims=True)
    e = jnp.exp(scores)
    denom = jnp.sum(e, axis=0, keepdims=True)
    prob = (e * pl.reciprocal(denom, approx=True)).astype(jnp.bfloat16)

    # x[c, n] = sum_m v[c, m] * prob_T[m, n]
    x = jnp.dot(v, prob, preferred_element_type=jnp.float32).astype(jnp.bfloat16)

    # merge 1x1 conv
    out = jnp.dot(wm_ref[...], x, preferred_element_type=jnp.float32) + bm_ref[...]
    o_ref[...] = out.astype(o_ref.dtype)


def multi_headed_attention(query, key, value, params):
    """query/key/value: (B, C, H, W) float32; params: dict of 1x1-conv weights/biases."""
    B, C, H, W = query.shape
    N = H * W
    C3 = 3 * C

    # NCHW -> (B, C, H*W) is a free row-major reshape; concatenating q/k/v along
    # channels gives one lane-dense (3C, N) input slab per batch (one DMA).
    # bf16 operands run the MXU at native rate; accumulation stays f32 in-kernel.
    xqkv = jnp.concatenate(
        [query.reshape(B, C, N), key.reshape(B, C, N), value.reshape(B, C, N)],
        axis=1).astype(jnp.bfloat16)

    # Block-diagonal projection weight with the 1/sqrt(d_model) scores scale
    # folded into the q block (weight AND bias), so the kernel never scales the
    # (N, N) scores.
    scale = 1.0 / jnp.sqrt(jnp.float32(C))
    w_blk = jnp.zeros((C3, C3), jnp.float32)
    w_blk = w_blk.at[0:C, 0:C].set(params["wq"] * scale)
    w_blk = w_blk.at[C:2 * C, C:2 * C].set(params["wk"])
    w_blk = w_blk.at[2 * C:, 2 * C:].set(params["wv"])
    w_blk = w_blk.astype(jnp.bfloat16)
    b_qkv = jnp.concatenate(
        [params["bq"] * scale, params["bk"], params["bv"]], axis=0)  # f32 (3C, 1)

    # Additive attention mask (precomputed once, resident in VMEM for all steps).
    row = jnp.arange(N, dtype=jnp.int32) // W
    mask = jnp.where(row[:, None] == row[None, :],
                     jnp.float32(0.0), jnp.float32(-1e30))

    wm = params["wm"].astype(jnp.bfloat16)
    bm = params["bm"]  # f32 (C, 1)

    out = pl.pallas_call(
        _mha_kernel,
        out_shape=jax.ShapeDtypeStruct((B, C, N), query.dtype),
        grid=(B,),
        in_specs=[
            pl.BlockSpec((None, C3, N), lambda b: (b, 0, 0)),   # fused q|k|v input
            pl.BlockSpec((C3, C3), lambda b: (0, 0)),           # block-diag weights
            pl.BlockSpec((C3, 1), lambda b: (0, 0)),            # q|k|v biases
            pl.BlockSpec((N, N), lambda b: (0, 0)),             # additive row mask
            pl.BlockSpec((C, C), lambda b: (0, 0)),             # merge weight
            pl.BlockSpec((C, 1), lambda b: (0, 0)),             # merge bias
        ],
        out_specs=pl.BlockSpec((None, C, N), lambda b: (b, 0, 0)),
        # Independent batch steps.  On 2-TC parts (e.g. v7x) the parallel axis
        # can be core-sharded; on single-TC v5e/v6e the second ~0.35us step is
        # negligible at this size.
        compiler_params=pltpu.CompilerParams(
            dimension_semantics=("parallel",)),
    )(xqkv, w_blk, b_qkv, mask, wm, bm)

    # (B, C, H*W) -> NCHW (free reshape).
    return out.reshape(B, C, H, W)


def _reference(query, key, value, params):
    """Pure-JAX f32 replica of the PyTorch forward (correctness check)."""
    def conv1x1(x, w, b):
        return jnp.einsum("oc,bchw->bohw", w, x) + b[:, 0][None, :, None, None]

    q = conv1x1(query, params["wq"], params["bq"])
    k = conv1x1(key,   params["wk"], params["bk"])
    v = conv1x1(value, params["wv"], params["bv"])
    dim = q.shape[1]
    scores = jnp.einsum("bdhn,bdhm->bhnm", q, k) / jnp.sqrt(jnp.float32(dim))
    prob = jax.nn.softmax(scores, axis=-1)
    x = jnp.einsum("bhnm,bdhm->bdhn", prob, v)
    return conv1x1(x, params["wm"], params["bm"])


def _init_params(key, d_model):
    """Deterministic synthetic init (Conv2d(d_model, d_model, 1) -> (C, C) + (C, 1))."""
    ks = jax.random.split(key, 8)
    scale = 1.0 / jnp.sqrt(jnp.float32(d_model))
    def w(k):  # weight (out_ch, in_ch) == squeezed (C, C, 1, 1)
        return jax.random.normal(k, (d_model, d_model), jnp.float32) * scale
    def b(k):  # bias kept as (C, 1) so it broadcasts over pixels inside the kernel
        return jax.random.normal(k, (d_model, 1), jnp.float32) * scale
    return {
        "wq": w(ks[0]), "bq": b(ks[1]),
        "wk": w(ks[2]), "bk": b(ks[3]),
        "wv": w(ks[4]), "bv": b(ks[5]),
        "wm": w(ks[6]), "bm": b(ks[7]),
    }


if __name__ == "__main__":
    # Small shapes consistent with the module: d_model=32, num_heads=4 (heads
    # only constrain d_model % num_heads == 0 -- the forward never splits heads).
    B, d_model, H, W = 2, 32, 8, 16
    num_heads = 4
    assert d_model % num_heads == 0

    key = jax.random.PRNGKey(0)
    kq, kk, kv, kp = jax.random.split(key, 4)
    query = jax.random.normal(kq, (B, d_model, H, W), jnp.float32)
    key_t = jax.random.normal(kk, (B, d_model, H, W), jnp.float32)
    value = jax.random.normal(kv, (B, d_model, H, W), jnp.float32)
    params = _init_params(kp, d_model)

    out = multi_headed_attention(query, key_t, value, params)
    out = jax.block_until_ready(out)

    ref = jax.block_until_ready(_reference(query, key_t, value, params))
    assert out.shape == (B, d_model, H, W)

    # bf16 MXU operands (+ approximate EUP reciprocal) vs the f32 reference:
    # check both element-wise closeness and aggregate relative error.
    max_err = float(jnp.max(jnp.abs(out - ref)))
    rel_fro = float(jnp.linalg.norm(out - ref) / jnp.linalg.norm(ref))
    assert max_err < 1e-1, f"max abs error {max_err} too large vs reference"
    assert rel_fro < 2e-2, f"relative Frobenius error {rel_fro} too large vs reference"

    print("KERNEL_OK")
</pallas_src>

<mosaic_0001>
module attributes {stable_mosaic.version = 11 : i64} {
  func.func @_mha_kernel(%arg0: i32, %arg1: memref<1x96x128xbf16, #tpu.memory_space<vmem>>, %arg2: memref<96x96xbf16, #tpu.memory_space<vmem>>, %arg3: memref<96x1xf32, #tpu.memory_space<vmem>>, %arg4: memref<128x128xf32, #tpu.memory_space<vmem>>, %arg5: memref<32x32xbf16, #tpu.memory_space<vmem>>, %arg6: memref<32x1xf32, #tpu.memory_space<vmem>>, %arg7: memref<1x32x128xf32, #tpu.memory_space<vmem>>) attributes {dimension_semantics = [#tpu.dimension_semantics<parallel>], iteration_bounds = array<i64: 2>, scalar_prefetch = 0 : i64, scratch_operands = 0 : i64, tpu.core_type = #tpu.core_type<tc>, window_params = [{transform_indices = @transform_0, window_bounds = array<i64: 1, 96, 128>}, {pipeline_mode = #tpu.pipeline_mode<synchronous>, transform_indices = @transform_1, window_bounds = array<i64: 96, 96>}, {pipeline_mode = #tpu.pipeline_mode<synchronous>, transform_indices = @transform_2, window_bounds = array<i64: 96, 1>}, {pipeline_mode = #tpu.pipeline_mode<synchronous>, transform_indices = @transform_3, window_bounds = array<i64: 128, 128>}, {pipeline_mode = #tpu.pipeline_mode<synchronous>, transform_indices = @transform_4, window_bounds = array<i64: 32, 32>}, {pipeline_mode = #tpu.pipeline_mode<synchronous>, transform_indices = @transform_5, window_bounds = array<i64: 32, 1>}, {transform_indices = @transform_6, window_bounds = array<i64: 1, 32, 128>}]} {
    %c0 = arith.constant 0 : index
    %c0_0 = arith.constant 0 : index
    %0 = vector.load %arg2[%c0, %c0_0] : memref<96x96xbf16, #tpu.memory_space<vmem>>, vector<96x96xbf16>
    %c0_1 = arith.constant 0 : index
    %c0_2 = arith.constant 0 : index
    %c0_3 = arith.constant 0 : index
    %1 = vector.load %arg1[%c0_1, %c0_2, %c0_3] : memref<1x96x128xbf16, #tpu.memory_space<vmem>>, vector<1x96x128xbf16>
    %2 = vector.shape_cast %1 : vector<1x96x128xbf16> to vector<96x128xbf16>
    %cst = arith.constant dense<0.000000e+00> : vector<96x128xf32>
    %3 = tpu.matmul %0, %2, %cst {dimension_numbers = #tpu.dot_dimension_numbers<[1], [0], [0], [1], [0, 0, 1, 1], [], []>} : vector<96x96xbf16>, vector<96x128xbf16>, vector<96x128xf32> -> vector<96x128xf32>
    %c0_4 = arith.constant 0 : index
    %c0_5 = arith.constant 0 : index
    %4 = vector.load %arg3[%c0_4, %c0_5] : memref<96x1xf32, #tpu.memory_space<vmem>>, vector<96x1xf32>
    %5 = vector.broadcast %4 : vector<96x1xf32> to vector<96x128xf32>
    %6 = arith.addf %3, %5 : vector<96x128xf32>
    %7 = vector.extract_strided_slice %6 {offsets = [0, 0], sizes = [32, 128], strides = [1, 1]} : vector<96x128xf32> to vector<32x128xf32>
    %8 = arith.truncf %7 : vector<32x128xf32> to vector<32x128xbf16>
    %9 = vector.extract_strided_slice %6 {offsets = [32, 0], sizes = [32, 128], strides = [1, 1]} : vector<96x128xf32> to vector<32x128xf32>
    %10 = arith.truncf %9 : vector<32x128xf32> to vector<32x128xbf16>
    %11 = vector.extract_strided_slice %6 {offsets = [64, 0], sizes = [32, 128], strides = [1, 1]} : vector<96x128xf32> to vector<32x128xf32>
    %12 = arith.truncf %11 : vector<32x128xf32> to vector<32x128xbf16>
    %cst_6 = arith.constant dense<0.000000e+00> : vector<128x128xf32>
    %13 = tpu.matmul %10, %8, %cst_6 {dimension_numbers = #tpu.dot_dimension_numbers<[0], [0], [1], [1], [0, 1, 1, 1], [], []>} : vector<32x128xbf16>, vector<32x128xbf16>, vector<128x128xf32> -> vector<128x128xf32>
    %c0_7 = arith.constant 0 : index
    %c0_8 = arith.constant 0 : index
    %14 = vector.load %arg4[%c0_7, %c0_8] : memref<128x128xf32, #tpu.memory_space<vmem>>, vector<128x128xf32>
    %15 = arith.addf %13, %14 : vector<128x128xf32>
    %cst_9 = arith.constant dense<0xFF800000> : vector<128xf32>
    %16 = vector.multi_reduction <maximumf>, %15, %cst_9 [0] : vector<128x128xf32> to vector<128xf32>
    %17 = vector.shape_cast %16 : vector<128xf32> to vector<1x128xf32>
    %18 = vector.broadcast %17 : vector<1x128xf32> to vector<128x128xf32>
    %19 = arith.subf %15, %18 : vector<128x128xf32>
    %20 = math.exp %19 : vector<128x128xf32>
    %cst_10 = arith.constant dense<0.000000e+00> : vector<128xf32>
    %21 = vector.multi_reduction <add>, %20, %cst_10 [0] : vector<128x128xf32> to vector<128xf32>
    %22 = vector.shape_cast %21 : vector<128xf32> to vector<1x128xf32>
    %23 = tpu.reciprocal %22 {approx = true} : vector<1x128xf32> -> vector<1x128xf32>
    %24 = vector.broadcast %23 : vector<1x128xf32> to vector<128x128xf32>
    %25 = arith.mulf %20, %24 : vector<128x128xf32>
    %26 = arith.truncf %25 : vector<128x128xf32> to vector<128x128xbf16>
    %cst_11 = arith.constant dense<0.000000e+00> : vector<32x128xf32>
    %27 = tpu.matmul %12, %26, %cst_11 {dimension_numbers = #tpu.dot_dimension_numbers<[1], [0], [0], [1], [0, 0, 1, 1], [], []>} : vector<32x128xbf16>, vector<128x128xbf16>, vector<32x128xf32> -> vector<32x128xf32>
    %28 = arith.truncf %27 : vector<32x128xf32> to vector<32x128xbf16>
    %c0_12 = arith.constant 0 : index
    %c0_13 = arith.constant 0 : index
    %29 = vector.load %arg5[%c0_12, %c0_13] : memref<32x32xbf16, #tpu.memory_space<vmem>>, vector<32x32xbf16>
    %cst_14 = arith.constant dense<0.000000e+00> : vector<32x128xf32>
    %30 = tpu.matmul %29, %28, %cst_14 {dimension_numbers = #tpu.dot_dimension_numbers<[1], [0], [0], [1], [0, 0, 1, 1], [], []>} : vector<32x32xbf16>, vector<32x128xbf16>, vector<32x128xf32> -> vector<32x128xf32>
    %c0_15 = arith.constant 0 : index
    %c0_16 = arith.constant 0 : index
    %31 = vector.load %arg6[%c0_15, %c0_16] : memref<32x1xf32, #tpu.memory_space<vmem>>, vector<32x1xf32>
    %32 = vector.broadcast %31 : vector<32x1xf32> to vector<32x128xf32>
    %33 = arith.addf %30, %32 : vector<32x128xf32>
    %c0_17 = arith.constant 0 : index
    %c0_18 = arith.constant 0 : index
    %c0_19 = arith.constant 0 : index
    %34 = vector.load %arg7[%c0_17, %c0_18, %c0_19] : memref<1x32x128xf32, #tpu.memory_space<vmem>>, vector<1x32x128xf32>
    %35 = vector.shape_cast %34 : vector<1x32x128xf32> to vector<32x128xf32>
    %36 = vector.shape_cast %33 : vector<32x128xf32> to vector<1x32x128xf32>
    tpu.vector_store %arg7[%c0_17, %c0_18, %c0_19], %36 {strides = array<i32>} : memref<1x32x128xf32, #tpu.memory_space<vmem>>, vector<1x32x128xf32>,
    return
  }
  func.func @transform_0(%arg0: i32) -> (i32, i32, i32) {
    %c0_i32 = arith.constant 0 : i32
    %c0_i32_0 = arith.constant 0 : i32
    %c0_i32_1 = arith.constant 0 : i32
    return %arg0, %c0_i32, %c0_i32_0 : i32, i32, i32
  }
  func.func @transform_1(%arg0: i32) -> (i32, i32) {
    %c0_i32 = arith.constant 0 : i32
    %c0_i32_0 = arith.constant 0 : i32
    %c0_i32_1 = arith.constant 0 : i32
    return %c0_i32, %c0_i32_0 : i32, i32
  }
  func.func @transform_2(%arg0: i32) -> (i32, i32) {
    %c0_i32 = arith.constant 0 : i32
    %c0_i32_0 = arith.constant 0 : i32
    %c0_i32_1 = arith.constant 0 : i32
    return %c0_i32, %c0_i32_0 : i32, i32
  }
  func.func @transform_3(%arg0: i32) -> (i32, i32) {
    %c0_i32 = arith.constant 0 : i32
    %c0_i32_0 = arith.constant 0 : i32
    %c0_i32_1 = arith.constant 0 : i32
    return %c0_i32, %c0_i32_0 : i32, i32
  }
  func.func @transform_4(%arg0: i32) -> (i32, i32) {
    %c0_i32 = arith.constant 0 : i32
    %c0_i32_0 = arith.constant 0 : i32
    %c0_i32_1 = arith.constant 0 : i32
    return %c0_i32, %c0_i32_0 : i32, i32
  }
  func.func @transform_5(%arg0: i32) -> (i32, i32) {
    %c0_i32 = arith.constant 0 : i32
    %c0_i32_0 = arith.constant 0 : i32
    %c0_i32_1 = arith.constant 0 : i32
    return %c0_i32, %c0_i32_0 : i32, i32
  }
  func.func @transform_6(%arg0: i32) -> (i32, i32, i32) {
    %c0_i32 = arith.constant 0 : i32
    %c0_i32_0 = arith.constant 0 : i32
    %c0_i32_1 = arith.constant 0 : i32
    return %arg0, %c0_i32, %c0_i32_0 : i32, i32, i32
  }
}

</mosaic_0001>

<bundles_post_ra>
// kernel: tpu_custom_call.1
= control target key start
LH: loop header
LB: loop body
LE: loop exit
PB: predicated region body
PF: predicated region fallthrough
CT: control target
= control target key end

     0   :  { %11 = vsyncpa [#allocation3], 0  ;;  %s1907_s0 = inlined_call_operand.hbm [shape: bf16[2,96,128], index: 0, kind: input, shape index: {}]   ;;  %s1908_s1 = inlined_call_operand.hbm [shape: bf16[96,96], index: 1, kind: input, shape index: {}]   ;;  %s1909_s2 = inlined_call_operand.vmem [shape: f32[96,1], index: 2, kind: input, shape index: {}]   ;;  %s1910_s3 = inlined_call_operand.vmem [shape: f32[128,128], index: 3, kind: input, shape index: {}]   ;;  %s1911_s4 = inlined_call_operand.vmem [shape: bf16[32,32], index: 4, kind: input, shape index: {}]   ;;  %s1912_s5 = inlined_call_operand.vmem [shape: f32[32,1], index: 5, kind: input, shape index: {}]   ;;  %s1913_s6 = inlined_call_operand.hbm [shape: f32[2,32,128], index: 6, kind: output, shape index: {}]  }
   0x1   :  { %13 = vsyncpa [#allocation3 + $0x1], 0 }
   0x2   :  { %14 = vsyncpa [#allocation6], 0 }
   0x3   :  { %15 = vsyncpa [#allocation4], 0 }
   0x4   :  { %17 = vsyncpa [#allocation4 + $0x1], 0  ;;  %s1508_s21 = smov 0   ;;  %s1510_s22 = smov 0  }
   0x5   :  { %s1512_s23 = smov 0   ;;  %s1514_s24 = smov 0  }
   0x6 LB: > { %s1529_s25 = sadd.s32 4294967295, %s1463_s24   ;;  %s1068_s26 = sadd.s32 4294967294, %s1463_s24   ;;  %s1463_s24 = sphi %s1514_s24, %s1937_s24   ;;  %s1459_s23 = sphi %s1512_s23, %s1936_s23   ;;  %s1455_s22 = sphi %s1510_s22, %s1935_s22   ;;  %s1451_s21 = sphi %s1508_s21, %s1934_s21  }
   0x7   : > { %p43_p0 = scmp.ne.s32.totalorder %s1455_s22, %s1451_s21  ;;  %p1914_p1 = scmp.eq.s32.totalorder %s1529_s25, 0 }
   0x8   : > { %p178_p3 = scmp.eq.s32.totalorder %s1068_s26, 1  ;;  %p1069_p5 = scmp.ge.s32.totalorder %s1463_s24, 1 }
   0x9   : > { %p1538_p4 = por %p1914_p1, %p43_p0  ;;  %p185_p7 = scmp.lt.s32.totalorder %s1463_s24, 3 }
   0xa   : > { %p1543_p6 = por %p178_p3, %p43_p0  ;;  %s1465_s30 = smov [#allocation5]  }
   0xb   : > { %s1919_s27 = scalar_select %p1538_p4, 1, 0 }
   0xc   : > { %s1920_s28 = scalar_select %p1543_p6, 1, 0 }
   0xd   : > { %p1548_p8 = pnand %p1069_p5, %p185_p7  ;;  %s197_s7 = sshll.u32 %s1465_s30, 4  ;;  %s1552_s7 = int_to_ptr.vmem [resolvable:$true] %s197_s7 }
   0xe   : > { %s1564_s9 = sadd.s32 1, %s1463_s24   ;;  %s30_s10 = sadd.s32 1, %s1459_s23 }
   0xf   : > { %s1921_s29 = scalar_select %p1548_p8, 1, 0 }
  0x10   : > { %p1231_p9 = pneg %p1548_p8  ;;  %s27_s11 = ssub.s32 %s1463_s24, %s1564_s9 }
  0x11   : > { %s1335_s14 = scalar_lea.hbm %s1908_s1, 768 }
  0x12   : > { %p1559_p11 = pnand %p1231_p9, %p1914_p1  ;;  %p1336_p12 = scmp.ne.s32.totalorder %s1908_s1, %s1335_s14 }
  0x13   : > { %p1342_p5 = scmp.lt.u32.totalorder %s1335_s14, %s1908_s1 }
  0x14   : > { %p1337_p13 = pneg %p1559_p11 }
  0x16   : > { %p1338_p0 = pnand %p1337_p13, %p1336_p12 }
  0x18   : > { %p1339_p3 = pneg %p1338_p0 }
  0x1a   : > { %p1344_p7 = pnand %p1342_p5, %p1339_p3 }
  0x1c   : > { %1347 = shalt.err (!%p1344_p7)
}
  0x1d   : > { %s1348_s19 = scalar_lea.vmem %s1552_s7, 768  ;;  %p1356_p2 = scmp.lt.s32.totalorder %s1552_s7, %s1552_s7 }
  0x1e   : > { %p1349_p9 = scmp.ne.s32.totalorder %s1552_s7, %s1348_s19  ;;  %p1357_p6 = scmp.lt.s32.totalorder %s1348_s19, %s1348_s19 }
  0x20   : > { %p1351_p10 = pnand %p1349_p9, %p1337_p13  ;;  %p1358_p4 = por %p1357_p6, %p1356_p2 }
  0x22   : > { %p1352_p1 = pneg %p1351_p10 }
  0x24   : > { %p1359_p8 = pnand %p1358_p4, %p1352_p1 }
  0x26   : > { %1362 = shalt.err (!%p1359_p8)
}
  0x27   : > { %s1917_s20 = smov 64   ;;  %s1918_s26 = smov 4  }
  0x28   : > { %1234 = dma.hbm_to_vmem [thread:$0]  (!%p1559_p11), %s1908_s1, 768, %s1552_s7, [#allocation6], %s1917_s20, %s1917_s20, %s1918_s26  }
  0x29   : > { %p28_p1 = scmp.eq.s32.totalorder %s27_s11, 0  ;;  %p37_p2 = scmp.ne.s32.totalorder %s1459_s23, %s1455_s22 }
  0x2a   : > { %p38_p4 = scmp.eq.s32.totalorder %s1463_s24, 0  ;;  %p1244_p6 = scmp.lt.s32.totalorder %s1463_s24, 2 }
  0x2b   : > { %s1598_s13 = scalar_select %p28_p1, %s1459_s23, %s30_s10  }
  0x2c   : > { %p39_p8 = por %p38_p4, %p37_p2  ;;  %p1923_p10 = scmp.eq.s32.totalorder %s1529_s25, 1 }
  0x2d   : > { %s223_s8 = sand.u32 1, %s1459_s23   ;;  %s1221_s15 = smul.u32 768, %s1463_s24 }
  0x2e   : > { %p1602_p12 = por %p1923_p10, %p37_p2  ;;  %s1220_s16 = smul.u32 48, %s223_s8 }
  0x2f   : > { %p1608_p13 = pnand %p1244_p6, %p39_p8  ;;  %s1615_s10 = scalar_lea.hbm %s1907_s0, %s1221_s15 }
  0x30   : > { %s227_s18 = scalar_lea.vmem [#allocation2], %s1220_s16  ;;  %s1619_s30 = scalar_lea.sflag [#allocation3], %s223_s8 }
  0x31   : > { %s234_s19 = sshll.u32 %s227_s18, 4  ;;  %s1363_s12 = scalar_lea.hbm %s1615_s10, 768  ;;  %s1617_s19 = int_to_ptr.vmem [resolvable:$true] %s234_s19 }
  0x32   : > { %p1364_p11 = scmp.ne.s32.totalorder %s1615_s10, %s1363_s12  ;;  %p1365_p0 = pneg %p1608_p13 }
  0x33   : > { %s1368_s11 = scalar_lea.hbm %s1907_s0, 1536  ;;  %p1369_p7 = scmp.lt.u32.totalorder %s1615_s10, %s1907_s0 }
  0x34   : > { %p1366_p3 = pnand %p1365_p0, %p1364_p11  ;;  %p1370_p9 = scmp.lt.u32.totalorder %s1368_s11, %s1363_s12 }
  0x35   : > { %p1372_p2 = scmp.lt.u32.totalorder %s1363_s12, %s1615_s10 }
  0x36   : > { %p1367_p5 = pneg %p1366_p3  ;;  %p1371_p1 = por %p1370_p9, %p1369_p7 }
  0x38   : > { %p1373_p4 = por %p1372_p2, %p1371_p1 }
  0x3a   : > { %p1374_p6 = pnand %p1373_p4, %p1367_p5 }
  0x3c   : > { %1377 = shalt.err (!%p1374_p6)
}
  0x3d   : > { %s1378_s8 = scalar_lea.vmem %s1617_s19, 768  ;;  %s1468_s16 = smov [#allocation2]  }
  0x3e   : > { %p1379_p8 = scmp.ne.s32.totalorder %s1617_s19, %s1378_s8  ;;  %s1383_s18 = sshll.u32 %s1468_s16, 4  ;;  %s1384_s18 = int_to_ptr.vmem [resolvable:$false] %s1383_s18 }
  0x3f   : > { %s1385_s20 = scalar_lea.vmem %s1384_s18, 1536  ;;  %p1386_p3 = scmp.lt.s32.totalorder %s1617_s19, %s1384_s18 }
  0x40   : > { %p1381_p10 = pnand %p1379_p8, %p1365_p0  ;;  %p1387_p7 = scmp.lt.s32.totalorder %s1385_s20, %s1378_s8 }
  0x42   : > { %p1382_p11 = pneg %p1381_p10  ;;  %p1388_p9 = por %p1387_p7, %p1386_p3 }
  0x44   : > { %p1389_p1 = pnand %p1388_p9, %p1382_p11 }
  0x46   : > { %1392 = shalt.err (!%p1389_p1)
}
  0x47   : > { %s1926_s26 = smov 4   ;;  %s1927_s12 = smov 64  }
  0x48   : > { %1238 = dma.hbm_to_vmem [thread:$0]  (!%p1608_p13), %s1615_s10, 768, %s1617_s19, %s1619_s30, %s1927_s12, %s1927_s12, %s1926_s26  }
  0x49   : > { %p1928_p0 = scmp.ne.s32.totalorder %s1921_s29, 0 }
  0x4a   : > { %s1653_s15 = sand.u32 (!%p1928_p0), 1, %s1455_s22   ;;  %p1929_p5 = scmp.ne.s32.totalorder (!%p1928_p0), %s1919_s27, 0 }
  0x4b   : > { %246 = sbr.rel (%p1928_p0) target bundleno = 1269 (0x4f5), region = 44  ;;  %s249_s11 = scalar_lea.sflag (!%p1928_p0), [#allocation3], %s1653_s15 }
  0x4c   : > { %s1222_s7 = smul.u32 (!%p1928_p0), 48, %s1653_s15 }
  0x4e   : > { %s252_s8 = scalar_lea.vmem (!%p1928_p0), [#allocation2], %s1222_s7 }
  0x52   : > { %1438 = dma.done.wait (%p1929_p5), %s249_s11, 768  }
  0x53   : > { %1440 = vsyncadd (%p1929_p5), %s249_s11, 4294966528  ;;  %p1930_p2 = scmp.eq.s32.totalorder %s1529_s25, 0 }
  0x55   : > { %1442 = dma.done.wait (%p1930_p2), [#allocation6], 768   ;;  %p1931_p13 = pmov %p1930_p2 }
  0x56   : > { %v1469_v0 = vmov 0   ;;  %v1287_v1 = vld [vmem:[%s252_s8] sm:$0xff]   ;;  %v1288_v2 = vld [vmem:[%s252_s8 + $0x8] sm:$0xff]   ;;  %v1289_v3 = vld [vmem:[%s252_s8 + $0x10] sm:$0xff]   ;;  %vm448_vm0 = vcmask 785408   ;;  %vm586_vm1 = vcmask 261120  }
  0x57   : > { %1444 = vsyncadd (%p1931_p13), [#allocation6], 4294966528  ;;  %1286 = vset.pattern.permute.xlu1 %v1469_v0  ;;  %1285 = vset.pattern.permute.xlu0 %v1469_v0  ;;  %v1293_v4 = vld [vmem:[#allocation5] sm:$0xff]   ;;  %v1290_v5 = vld [vmem:[%s252_s8 + $0x18] sm:$0xff]   ;;  %s1075_s11 = sshll.u32 %s1653_s15, 5  ;;  %s1111_s29 = sshll.u32 %s1529_s25, 9 }
  0x58   : > { %1148 = vmatprep.subr.bf16.mxu0 %v1287_v1  ;;  %1160 = vmatprep.mubr.msk.bf16.mxu0 %vm448_vm0, %v1293_v4  ;;  %v1291_v6 = vld [vmem:[%s252_s8 + $0x20] sm:$0xff]   ;;  %v317_v8 = vld [vmem:[%s1909_s2 + $0x38] sm:$0xff]  ;;  %v315_v11 = vld [vmem:[%s1909_s2 + $0x28] sm:$0xff]  ;;  %s1863_s19 = scalar_lea.hbm %s1913_s6, %s1111_s29  ;;  %s972_s25 = scalar_lea.sflag [#allocation4], %s1653_s15 }
  0x59   : > { %1149 = vmatpush3.bf16.msra.mxu0 %v1287_v1  ;;  %v316_v7 = vld [vmem:[%s1909_s2 + $0x30] sm:$0xff]  ;;  %v314_v9 = vld [vmem:[%s1909_s2 + $0x20] sm:$0xff]  ;;  %v1292_v10 = vld [vmem:[%s252_s8 + $0x28] sm:$0xff]   ;;  %s284_s8 = scalar_lea.vmem [#allocation7], %s1075_s11  ;;  %s1470_s16 = smov [#allocation7]  }
  0x5a   : > { %1150 = vmatprep.subr.bf16.mxu0 %v1288_v2  ;;  %354 = vperm.xlu1 %1286, %v316_v7   ;;  %v311_v12 = vld [vmem:[%s1909_s2 + $0x8] sm:$0xff]  ;;  %v310_v13 = vld [vmem:[%s1909_s2] sm:$0xff]  ;;  %v313_v15 = vld [vmem:[%s1909_s2 + $0x18] sm:$0xff]  ;;  %s985_s27 = sshll.u32 %s284_s8, 4  ;;  %s1397_s18 = sshll.u32 %s1470_s16, 4  ;;  %s1858_s27 = int_to_ptr.vmem [resolvable:$true] %s985_s27  ;;  %s1398_s18 = int_to_ptr.vmem [resolvable:$false] %s1397_s18 }
  0x5b   : > { %344 = vperm.xlu0 %1285, %v314_v9   ;;  %v1294_v14 = vld [vmem:[#allocation5 + $0x8] sm:$0xff]   ;;  %v1295_v16 = vld [vmem:[#allocation5 + $0x10] sm:$0xff]   ;;  %v318_v18 = vld [vmem:[%s1909_s2 + $0x40] sm:$0xff]  ;;  %s1393_s30 = scalar_lea.vmem %s1858_s27, 512  ;;  %s1399_s20 = scalar_lea.vmem %s1398_s18, 1024 }
  0x5c   : > { %v312_v17 = vld [vmem:[%s1909_s2 + $0x10] sm:$0xff]  ;;  %v1296_v19 = vld [vmem:[#allocation5 + $0x18] sm:$0xff]   ;;  %v319_v20 = vld [vmem:[%s1909_s2 + $0x48] sm:$0xff]  ;;  %p1394_p4 = scmp.ne.s32.totalorder %s1858_s27, %s1393_s30  ;;  %p1400_p10 = scmp.lt.s32.totalorder %s1858_s27, %s1398_s18 }
  0x5d   : > { %1151 = vmatpush3.bf16.msra.mxu0 %v1288_v2  ;;  %v1297_v21 = vld [vmem:[#allocation5 + $0x20] sm:$0xff]   ;;  %v320_v22 = vld [vmem:[%s1909_s2 + $0x50] sm:$0xff]  ;;  %v1298_v23 = vld [vmem:[#allocation5 + $0x28] sm:$0xff]   ;;  %p1401_p11 = scmp.lt.s32.totalorder %s1399_s20, %s1393_s30 }
  0x5e   : > { %1152 = vmatprep.subr.bf16.mxu0 %v1289_v3  ;;  %359 = vperm.xlu1 %1286, %v317_v8   ;;  %v321_v24 = vld [vmem:[%s1909_s2 + $0x58] sm:$0xff]  ;;  %v878_v25 = vld [vmem:[%s1912_s5] sm:$0xff]  ;;  %v879_v26 = vld [vmem:[%s1912_s5 + $0x8] sm:$0xff]  ;;  %p1395_p6 = pnand %p1394_p4, %p1602_p12 }
  0x5f   : > { %349 = vperm.xlu0 %1285, %v315_v11   ;;  %v880_v27 = vld [vmem:[%s1912_s5 + $0x10] sm:$0xff]  ;;  %v881_v28 = vld [vmem:[%s1912_s5 + $0x18] sm:$0xff]  ;;  %p1402_p3 = por %p1401_p11, %p1400_p10 }
  0x60   : > { %p1396_p8 = pneg %p1395_p6 }
  0x61   : > { %1153 = vmatpush3.bf16.msra.mxu0 %v1289_v3 }
  0x62   : > { %1154 = vmatprep.subr.bf16.mxu0 %v1290_v5  ;;  %329 = vperm.xlu1 %1286, %v311_v12   ;;  %p1403_p7 = pnand %p1402_p3, %p1396_p8 }
  0x63   : > { %324 = vperm.xlu0 %1285, %v310_v13  }
  0x65   : > { %1155 = vmatpush3.bf16.msra.mxu0 %v1290_v5 }
  0x66   : > { %1156 = vmatprep.subr.bf16.mxu0 %v1291_v6  ;;  %339 = vperm.xlu1 %1286, %v313_v15  }
  0x67   : > { %334 = vperm.xlu0 %1285, %v312_v17  }
  0x69   : > { %1157 = vmatpush3.bf16.msra.mxu0 %v1291_v6 }
  0x6a   : > { %1158 = vmatprep.subr.bf16.mxu0 %v1292_v10  ;;  %364 = vperm.xlu1 %1286, %v318_v18  }
  0x6d   : > { %1159 = vmatpush3.bf16.msra.mxu0 %v1292_v10 }
  0x6e   : > { %369 = vperm.xlu1 %1286, %v319_v20   ;;  %v560_v20 = vld [vmem:[%s1910_s3 + $0x30] sm:$0xff] }
  0x70   : > { %1161 = vmatmul.mubr.msk.bf16.vlgmr.msra.gmra.mrb[0].mxu0 %vm448_vm0, %v1294_v14 }
  0x71   : > { %1164 = vmatprep.mubr.msk.bf16.mxu0 %vm448_vm0, %v1295_v16 }
  0x72   : > { %374 = vperm.xlu1 %1286, %v320_v22   ;;  %v558_v22 = vld [vmem:[%s1910_s3 + $0x20] sm:$0xff] }
  0x76   : > { %379 = vperm.xlu1 %1286, %v321_v24  }
  0x78   : > { %1165 = vmatmul.mubr.msk.bf16.gmra.mrb[4].mxu0 %vm448_vm0, %v1296_v19  ;;  %v556_v19 = vld [vmem:[%s1910_s3 + $0x10] sm:$0xff] }
  0x79   : > { %1168 = vmatprep.mubr.msk.bf16.mxu0 %vm448_vm0, %v1297_v21  ;;  %v554_v21 = vld [vmem:[%s1910_s3] sm:$0xff] }
  0x7a   : > { %884 = vperm.xlu1 %1286, %v878_v25   ;;  %v561_v25 = vld [vmem:[%s1910_s3 + $0x38] sm:$0xff] }
  0x7e   : > { %889 = vperm.xlu1 %1286, %v879_v26  }
  0x80   : > { %1169 = vmatmul.mubr.msk.bf16.gmra.mrb[8].mxu0 %vm448_vm0, %v1298_v23  ;;  %v557_v23 = vld [vmem:[%s1910_s3 + $0x18] sm:$0xff] }
  0x82   : > { %894 = vperm.xlu1 %1286, %v880_v27   ;;  %v555_v27 = vld [vmem:[%s1910_s3 + $0x8] sm:$0xff] }
  0x86   : > { %899 = vperm.xlu1 %1286, %v881_v28  }
  0xd9   : > { %v355_v29 = vpop.permute.xlu1 %354 }
  0xda   : > { %v345_v30 = vpop.permute.xlu0 %344 }
  0xdd   : > { %v360_v31 = vpop.permute.xlu1 %359 }
  0xde   : > { %v350_v32 = vpop.permute.xlu0 %349 }
  0xe1   : > { %v330_v33 = vpop.permute.xlu1 %329 }
  0xe2   : > { %v325_v34 = vpop.permute.xlu0 %324 }
  0xe5   : > { %v340_v35 = vpop.permute.xlu1 %339 }
  0xe6   : > { %v335_v36 = vpop.permute.xlu0 %334 }
  0xe9   : > { %v365_v37 = vpop.permute.xlu1 %364 }
  0xed   : > { %v370_v47 = vpop.permute.xlu1 %369 }
  0xf1   : > { %v375_v55 = vpop.permute.xlu1 %374 }
  0xf5   : > { %v380_v62 = vpop.permute.xlu1 %379 }
 0x143   : > { %v1162_v38 = vpop.f32.mrb[0].mxu0 }
 0x144   : > { %v501_v39 = vpop.f32.mrb[1].mxu0  ;;  %v510_v41 = vadd.f32 %v1162_v38, %v335_v36 }
 0x145   : > { %v1163_v40 = vpop.f32.mrb[2].mxu0  ;;  %v502_v44 = vadd.f32 %v501_v39, %v325_v34 }
 0x146   : > { %v513_v42 = vadd.f32 %v1163_v40, %v340_v35  ;;  %v504_v43 = vpop.f32.mrb[3].mxu0 }
 0x147   : > { %v505_v45 = vadd.f32 %v504_v43, %v330_v33  ;;  %v564_v43 = vld [vmem:[%s1910_s3 + $0x50] sm:$0xff] }
 0x148   : > { %v549_v46 = vpack.c.bf16 %v513_v42, %v510_v41 }
 0x149   : > { %v548_v48 = vpack.c.bf16 %v505_v45, %v502_v44  ;;  %v562_v44 = vld [vmem:[%s1910_s3 + $0x40] sm:$0xff] }
 0x14b   : > { %v1166_v49 = vpop.f32.mrb[4].mxu0  ;;  %1172 = vmatprep.subr.bf16.mxu1 %v548_v48 }
 0x14c   : > { %v517_v50 = vpop.f32.mrb[5].mxu0  ;;  %1173 = vmatpush3.bf16.msra.mxu1 %v548_v48  ;;  %v526_v52 = vadd.f32 %v1166_v49, %v355_v29  ;;  %v563_v49 = vld [vmem:[%s1910_s3 + $0x48] sm:$0xff] }
 0x14d   : > { %v1167_v51 = vpop.f32.mrb[6].mxu0  ;;  %1174 = vmatprep.subr.bf16.mxu1 %v549_v46  ;;  %v518_v56 = vadd.f32 %v517_v50, %v345_v30  ;;  %v559_v30 = vld [vmem:[%s1910_s3 + $0x28] sm:$0xff] }
 0x14e   : > { %v529_v53 = vadd.f32 %v1167_v51, %v360_v31  ;;  %v520_v54 = vpop.f32.mrb[7].mxu0 }
 0x14f   : > { %v521_v57 = vadd.f32 %v520_v54, %v350_v32 }
 0x150   : > { %v551_v58 = vpack.c.bf16 %v529_v53, %v526_v52  ;;  %1175 = vmatpush3.bf16.msra.mxu1 %v549_v46  ;;  %v565_v46 = vld [vmem:[%s1910_s3 + $0x58] sm:$0xff] }
 0x151   : > { %v550_v59 = vpack.c.bf16 %v521_v57, %v518_v56 }
 0x153   : > { %v1170_v60 = vpop.f32.mrb[8].mxu0  ;;  %570 = vxpose.xlu0.c.b16.start [1/2] (short) %v550_v59, 128  ;;  %v568_v59 = vld [vmem:[%s1910_s3 + $0x70] sm:$0xff] }
 0x154   : > { %v533_v61 = vpop.f32.mrb[9].mxu0  ;;  %v1719_v0 = vadd.f32 %v1170_v60, %v375_v55  ;;  %v566_v60 = vld [vmem:[%s1910_s3 + $0x60] sm:$0xff] }
 0x155   : > { %v1171_v63 = vpop.f32.mrb[10].mxu0  ;;  %v534_v3 = vadd.f32 %v533_v61, %v365_v37 }
 0x156   : > { %v1721_v1 = vadd.f32 %v1171_v63, %v380_v62  ;;  %v536_v2 = vpop.f32.mrb[11].mxu0  ;;  %v569_v62 = vld [vmem:[%s1910_s3 + $0x78] sm:$0xff] }
 0x157   : > { %v537_v4 = vadd.f32 %v536_v2, %v370_v47  ;;  %571 = vxpose.xlu0.c.b16.end [2/2] (short) %v551_v58, 128 }
 0x158   : > { %v553_v5 = vpack.c.bf16 %v1721_v1, %v1719_v0  ;;  %v1300_v0 = vld [vmem:[%s1911_s4 + $0x8] sm:$0xff]   ;;  %v885_v1 = vpop.permute.xlu1 %884 }
 0x159   : > { %v552_v6 = vpack.c.bf16 %v537_v4, %v534_v3  ;;  %v567_v3 = vld [vmem:[%s1910_s3 + $0x68] sm:$0xff] }
 0x1b9   : > { %v578_v7 = vpop.trf.xlu0 }
 0x1ba   : > { %1176 = vmatprep.mubr.msk.bf16.mxu1 %vm586_vm1, %v578_v7 }
 0x1bd   : > { %v579_v8 = vpop.trf.xlu0 }
 0x1be   : > { %1177 = vmatmul.mubr.msk.bf16.vlgmr.msra.gmra.mrb[0].mxu1 %vm586_vm1, %v579_v8 }
 0x1c1   : > { %v580_v9 = vpop.trf.xlu0 }
 0x1c2   : > { %1180 = vmatprep.mubr.msk.bf16.mxu1 %vm586_vm1, %v580_v9 }
 0x1c5   : > { %v581_v10 = vpop.trf.xlu0 }
 0x1c6   : > { %1181 = vmatmul.mubr.msk.bf16.gmra.mrb[4].mxu1 %vm586_vm1, %v581_v10 }
 0x1c9   : > { %v582_v11 = vpop.trf.xlu0 }
 0x1ca   : > { %1184 = vmatprep.mubr.msk.bf16.mxu1 %vm586_vm1, %v582_v11 }
 0x1cd   : > { %v583_v12 = vpop.trf.xlu0 }
 0x1ce   : > { %1185 = vmatmul.mubr.msk.bf16.gmra.mrb[8].mxu1 %vm586_vm1, %v583_v12 }
 0x1d1   : > { %v584_v13 = vpop.trf.xlu0 }
 0x1d2   : > { %1188 = vmatprep.mubr.msk.bf16.mxu1 %vm586_vm1, %v584_v13 }
 0x1d5   : > { %v585_v14 = vpop.trf.xlu0 }
 0x1d6   : > { %1189 = vmatmul.mubr.msk.bf16.gmra.mrb[12].mxu1 %vm586_vm1, %v585_v14 }
 0x1d7   : > { %1208 = vmatprep.mubr.bf16.mxu1 %v552_v6 }
 0x291   : > { %v1178_v15 = vpop.f32.mrb[0].mxu1 }
 0x292   : > { %v645_v16 = vpop.f32.mrb[1].mxu1  ;;  %v1751_v26 = vadd.f32 %v1178_v15, %v556_v19 }
 0x293   : > { %v1179_v17 = vpop.f32.mrb[2].mxu1  ;;  %v1761_v31 = vadd.f32 %v645_v16, %v554_v21 }
 0x294   : > { %v648_v18 = vpop.f32.mrb[3].mxu1  ;;  %v1765_v34 = vadd.f32 %v1179_v17, %v557_v23 }
 0x295   : > { %v1771_v38 = vadd.f32 %v648_v18, %v555_v27 }
 0x299   : > { %v1182_v24 = vpop.f32.mrb[4].mxu1 }
 0x29a   : > { %v1756_v28 = vadd.f32 %v1182_v24, %v560_v20  ;;  %v661_v29 = vpop.f32.mrb[5].mxu1 }
 0x29b   : > { %v1763_v32 = vadd.f32 %v661_v29, %v558_v22  ;;  %v1183_v33 = vpop.f32.mrb[6].mxu1 }
 0x29c   : > { %v710_v35 = vmax.f32 %v1751_v26, %v1756_v28  ;;  %v1769_v36 = vadd.f32 %v1183_v33, %v561_v25  ;;  %v664_v37 = vpop.f32.mrb[7].mxu1 }
 0x29d   : > { %v708_v39 = vmax.f32 %v1761_v31, %v1763_v32  ;;  %v1775_v40 = vadd.f32 %v664_v37, %v559_v30 }
 0x29e   : > { %v711_v41 = vmax.f32 %v1765_v34, %v1769_v36 }
 0x29f   : > { %v709_v42 = vmax.f32 %v1771_v38, %v1775_v40 }
 0x2a1   : > { %v1186_v45 = vpop.f32.mrb[8].mxu1 }
 0x2a2   : > { %v1790_v47 = vadd.f32 %v1186_v45, %v564_v43  ;;  %v677_v48 = vpop.f32.mrb[9].mxu1 }
 0x2a3   : > { %v1795_v50 = vadd.f32 %v677_v48, %v562_v44  ;;  %v1187_v51 = vpop.f32.mrb[10].mxu1 }
 0x2a4   : > { %v714_v52 = vmax.f32 %v710_v35, %v1790_v47  ;;  %v1798_v53 = vadd.f32 %v1187_v51, %v565_v46  ;;  %v680_v54 = vpop.f32.mrb[11].mxu1 }
 0x2a5   : > { %v712_v55 = vmax.f32 %v708_v39, %v1795_v50  ;;  %v1801_v56 = vadd.f32 %v680_v54, %v563_v49 }
 0x2a6   : > { %v715_v57 = vmax.f32 %v711_v41, %v1798_v53 }
 0x2a7   : > { %v713_v58 = vmax.f32 %v709_v42, %v1801_v56 }
 0x2a9   : > { %v1190_v61 = vpop.f32.mrb[12].mxu1 }
 0x2aa   : > { %v1814_v63 = vadd.f32 %v1190_v61, %v568_v59  ;;  %v693_v2 = vpop.f32.mrb[13].mxu1 }
 0x2ab   : > { %v1819_v4 = vadd.f32 %v693_v2, %v566_v60  ;;  %v1191_v6 = vpop.f32.mrb[14].mxu1 }
 0x2ac   : > { %v718_v7 = vmax.f32 %v714_v52, %v1814_v63  ;;  %v1822_v8 = vadd.f32 %v1191_v6, %v569_v62  ;;  %v696_v9 = vpop.f32.mrb[15].mxu1 }
 0x2ad   : > { %v716_v10 = vmax.f32 %v712_v55, %v1819_v4  ;;  %v1825_v11 = vadd.f32 %v696_v9, %v567_v3 }
 0x2ae   : > { %v719_v12 = vmax.f32 %v715_v57, %v1822_v8 }
 0x2af   : > { %v717_v13 = vmax.f32 %v713_v58, %v1825_v11 }
 0x2b0   : > { %v721_v14 = vmax.f32 %v718_v7, %v719_v12 }
 0x2b1   : > { %v720_v15 = vmax.f32 %v716_v10, %v717_v13 }
 0x2b3   : > { %v722_v16 = vmax.f32 %v720_v15, %v721_v14 }
 0x2b5   : > { %v723_v17 = vrot.slane %v722_v16, 4 }
 0x2b7   : > { %v724_v18 = vmax.f32 %v722_v16, %v723_v17 }
 0x2b9   : > { %v725_v19 = vrot.slane %v724_v18, 2 }
 0x2bb   : > { %v726_v20 = vmax.f32 %v724_v18, %v725_v19 }
 0x2bd   : > { %v727_v21 = vrot.slane %v726_v20, 1 }
 0x2bf   : > { %v728_v22 = vmax.f32 %v726_v20, %v727_v21 }
 0x2c1   : > { %v729_v23 = vsub.f32 %v1761_v31, %v728_v22  ;;  %v730_v24 = vsub.f32 %v1771_v38, %v728_v22  ;;  %v731_v25 = vsub.f32 %v1751_v26, %v728_v22  ;;  %v732_v27 = vsub.f32 %v1765_v34, %v728_v22 }
 0x2c2   : > { %v733_v29 = vsub.f32 %v1763_v32, %v728_v22  ;;  %v734_v30 = vsub.f32 %v1775_v40, %v728_v22  ;;  %v735_v33 = vsub.f32 %v1756_v28, %v728_v22  ;;  %v736_v35 = vsub.f32 %v1769_v36, %v728_v22 }
 0x2c3   : > { %v737_v37 = vsub.f32 %v1795_v50, %v728_v22  ;;  %v738_v39 = vsub.f32 %v1801_v56, %v728_v22  ;;  %v739_v31 = vsub.f32 %v1790_v47, %v728_v22  ;;  %v740_v38 = vsub.f32 %v1798_v53, %v728_v22 }
 0x2c4   : > { %v741_v26 = vsub.f32 %v1819_v4, %v728_v22  ;;  %v742_v34 = vsub.f32 %v1825_v11, %v728_v22  ;;  %v743_v32 = vsub.f32 %v1814_v63, %v728_v22  ;;  %v744_v40 = vsub.f32 %v1822_v8, %v728_v22 }
 0x2c5   : > { %v745_v41 = vmul.f32 1.442695, %v729_v23  ;;  %v747_v28 = vmul.f32 1.442695, %v730_v24  ;;  %v749_v42 = vmul.f32 1.442695, %v731_v25 }
 0x2c6   : > { %v751_v36 = vmul.f32 1.442695, %v732_v27  ;;  %v753_v43 = vmul.f32 1.442695, %v733_v29  ;;  %v755_v44 = vmul.f32 1.442695, %v734_v30 }
 0x2c7   : > { %1301 = vpow2.f32 %v745_v41  ;;  %v757_v45 = vmul.f32 1.442695, %v735_v33  ;;  %v759_v46 = vmul.f32 1.442695, %v736_v35  ;;  %v761_v49 = vmul.f32 1.442695, %v737_v37 }
 0x2c8   : > { %1303 = vpow2.f32 %v747_v28  ;;  %v763_v52 = vmul.f32 1.442695, %v738_v39  ;;  %v765_v55 = vmul.f32 1.442695, %v739_v31  ;;  %v767_v58 = vmul.f32 1.442695, %v740_v38 }
 0x2c9   : > { %1305 = vpow2.f32 %v749_v42  ;;  %v769_v61 = vmul.f32 1.442695, %v741_v26  ;;  %v771_v2 = vmul.f32 1.442695, %v742_v34  ;;  %v773_v6 = vmul.f32 1.442695, %v743_v32 }
 0x2ca   : > { %1307 = vpow2.f32 %v751_v36  ;;  %v775_v9 = vmul.f32 1.442695, %v744_v40 }
 0x2cb   : > { %1309 = vpow2.f32 %v753_v43 }
 0x2cc   : > { %1311 = vpow2.f32 %v755_v44 }
 0x2cd   : > { %1313 = vpow2.f32 %v757_v45 }
 0x2ce   : > { %1315 = vpow2.f32 %v759_v46 }
 0x2cf   : > { %1317 = vpow2.f32 %v761_v49 }
 0x2d0   : > { %1319 = vpow2.f32 %v763_v52 }
 0x2d1   : > { %v1302_v47 = vpop.eup %1301  ;;  %1321 = vpow2.f32 %v765_v55 }
 0x2d2   : > { %v1304_v48 = vpop.eup %1303  ;;  %1323 = vpow2.f32 %v767_v58 }
 0x2d3   : > { %v777_v50 = vadd.f32 %v1304_v48, %v1302_v47  ;;  %v1306_v51 = vpop.eup %1305  ;;  %1325 = vpow2.f32 %v769_v61 }
 0x2d4   : > { %v1308_v54 = vpop.eup %1307  ;;  %1327 = vpow2.f32 %v771_v2 }
 0x2d5   : > { %v778_v53 = vadd.f32 %v1306_v51, %v777_v50  ;;  %v1310_v57 = vpop.eup %1309  ;;  %1329 = vpow2.f32 %v773_v6 }
 0x2d6   : > { %v1312_v60 = vpop.eup %1311  ;;  %1331 = vpow2.f32 %v775_v9 }
 0x2d7   : > { %v779_v56 = vadd.f32 %v1308_v54, %v778_v53  ;;  %v1314_v63 = vpop.eup %1313 }
 0x2d8   : > { %v1316_v4 = vpop.eup %1315 }
 0x2d9   : > { %v780_v59 = vadd.f32 %v1310_v57, %v779_v56  ;;  %v1318_v8 = vpop.eup %1317  ;;  %v1299_v56 = vld [vmem:[%s1911_s4] sm:$0xff]  }
 0x2da   : > { %v1320_v11 = vpop.eup %1319  ;;  %1216 = vmatprep.mubr.msk.bf16.mxu0 %vm586_vm1, %v1299_v56 }
 0x2db   : > { %v781_v62 = vadd.f32 %v1312_v60, %v780_v59  ;;  %v1322_v13 = vpop.eup %1321 }
 0x2dc   : > { %v1324_v15 = vpop.eup %1323 }
 0x2dd   : > { %v782_v3 = vadd.f32 %v1314_v63, %v781_v62  ;;  %v1326_v17 = vpop.eup %1325 }
 0x2de   : > { %v1328_v19 = vpop.eup %1327 }
 0x2df   : > { %v783_v7 = vadd.f32 %v1316_v4, %v782_v3  ;;  %v1330_v21 = vpop.eup %1329 }
 0x2e0   : > { %v1332_v23 = vpop.eup %1331 }
 0x2e1   : > { %v784_v10 = vadd.f32 %v1318_v8, %v783_v7 }
 0x2e3   : > { %v785_v12 = vadd.f32 %v1320_v11, %v784_v10 }
 0x2e5   : > { %v786_v14 = vadd.f32 %v1322_v13, %v785_v12 }
 0x2e7   : > { %v787_v16 = vadd.f32 %v1324_v15, %v786_v14 }
 0x2e9   : > { %v788_v18 = vadd.f32 %v1326_v17, %v787_v16 }
 0x2eb   : > { %v789_v20 = vadd.f32 %v1328_v19, %v788_v18 }
 0x2ed   : > { %v790_v22 = vadd.f32 %v1330_v21, %v789_v20 }
 0x2ef   : > { %v791_v24 = vadd.f32 %v1332_v23, %v790_v22 }
 0x2f1   : > { %v792_v25 = vrot.slane %v791_v24, 4 }
 0x2f3   : > { %v793_v27 = vadd.f32 %v792_v25, %v791_v24 }
 0x2f5   : > { %v794_v29 = vrot.slane %v793_v27, 2 }
 0x2f7   : > { %v795_v30 = vadd.f32 %v794_v29, %v793_v27 }
 0x2f9   : > { %v796_v33 = vrot.slane %v795_v30, 1 }
 0x2fb   : > { %v797_v35 = vadd.f32 %v796_v33, %v795_v30 }
 0x2fd   : > { %1333 = vrcp.f32 %v797_v35 }
 0x307   : > { %v1334_v37 = vpop.eup %1333 }
 0x308   : > { %v799_v39 = vmul.f32 %v1334_v37, %v1302_v47  ;;  %v800_v31 = vmul.f32 %v1334_v37, %v1304_v48  ;;  %v801_v38 = vmul.f32 %v1334_v37, %v1306_v51  ;;  %v802_v26 = vmul.f32 %v1334_v37, %v1308_v54 }
 0x309   : > { %v803_v34 = vmul.f32 %v1334_v37, %v1310_v57  ;;  %v804_v32 = vmul.f32 %v1334_v37, %v1312_v60  ;;  %v805_v40 = vmul.f32 %v1334_v37, %v1314_v63  ;;  %v806_v41 = vmul.f32 %v1334_v37, %v1316_v4 }
 0x30a   : > { %v815_v28 = vpack.c.bf16 %v800_v31, %v799_v39  ;;  %v816_v42 = vpack.c.bf16 %v802_v26, %v801_v38  ;;  %v807_v36 = vmul.f32 %v1334_v37, %v1318_v8  ;;  %v808_v43 = vmul.f32 %v1334_v37, %v1320_v11 }
 0x30b   : > { %v817_v44 = vpack.c.bf16 %v804_v32, %v803_v34  ;;  %v818_v45 = vpack.c.bf16 %v806_v41, %v805_v40  ;;  %v809_v46 = vmul.f32 %v1334_v37, %v1322_v13  ;;  %v810_v49 = vmul.f32 %v1334_v37, %v1324_v15 }
 0x30c   : > { %1192 = vmatprep.subr.bf16.mxu1 %v815_v28  ;;  %v819_v50 = vpack.c.bf16 %v808_v43, %v807_v36  ;;  %v811_v52 = vmul.f32 %v1334_v37, %v1326_v17  ;;  %v812_v53 = vmul.f32 %v1334_v37, %v1328_v19  ;;  %v813_v47 = vmul.f32 %v1334_v37, %v1330_v21 }
 0x30d   : > { %1193 = vmatpush3.bf16.msra.mxu1 %v815_v28  ;;  %v820_v48 = vpack.c.bf16 %v810_v49, %v809_v46  ;;  %v814_v51 = vmul.f32 %v1334_v37, %v1332_v23 }
 0x30e   : > { %1194 = vmatprep.subr.bf16.mxu1 %v816_v42  ;;  %v821_v54 = vpack.c.bf16 %v812_v53, %v811_v52 }
 0x30f   : > { %v822_v55 = vpack.c.bf16 %v814_v51, %v813_v47 }
 0x311   : > { %1195 = vmatpush3.bf16.msra.mxu1 %v816_v42 }
 0x312   : > { %1196 = vmatprep.subr.bf16.mxu1 %v817_v44 }
 0x315   : > { %1197 = vmatpush3.bf16.msra.mxu1 %v817_v44 }
 0x316   : > { %1198 = vmatprep.subr.bf16.mxu1 %v818_v45 }
 0x319   : > { %1199 = vmatpush3.bf16.msra.mxu1 %v818_v45 }
 0x31a   : > { %1200 = vmatprep.subr.bf16.mxu1 %v819_v50 }
 0x31d   : > { %1201 = vmatpush3.bf16.msra.mxu1 %v819_v50 }
 0x31e   : > { %1202 = vmatprep.subr.bf16.mxu1 %v820_v48 }
 0x321   : > { %1203 = vmatpush3.bf16.msra.mxu1 %v820_v48 }
 0x322   : > { %1204 = vmatprep.subr.bf16.mxu1 %v821_v54 }
 0x325   : > { %1205 = vmatpush3.bf16.msra.mxu1 %v821_v54 }
 0x326   : > { %1206 = vmatprep.subr.bf16.mxu1 %v822_v55 }
 0x329   : > { %1207 = vmatpush3.bf16.msra.mxu1 %v822_v55 }
 0x32c   : > { %1209 = vmatmul.mubr.bf16.vlgmr.msra.gmra.mrb[16].mxu1 %v553_v5  ;;  %v890_v5 = vpop.permute.xlu1 %889 }
 0x330   : > { %v895_v63 = vpop.permute.xlu1 %894 }
 0x334   : > { %v900_v6 = vpop.permute.xlu1 %899 }
 0x3ff   : > { %v1210_v57 = vpop.f32.mrb[16].mxu1 }
 0x400   : > { %v857_v58 = vpop.f32.mrb[17].mxu1 }
 0x401   : > { %v1211_v59 = vpop.f32.mrb[18].mxu1 }
 0x402   : > { %v873_v60 = vpack.c.bf16 %v1211_v59, %v1210_v57  ;;  %v860_v61 = vpop.f32.mrb[19].mxu1 }
 0x403   : > { %v872_v62 = vpack.c.bf16 %v860_v61, %v857_v58 }
 0x405   : > { %1212 = vmatprep.subr.bf16.mxu0 %v872_v62 }
 0x406   : > { %1213 = vmatpush3.bf16.msra.mxu0 %v872_v62 }
 0x407   : > { %1214 = vmatprep.subr.bf16.mxu0 %v873_v60 }
 0x40a   : > { %1215 = vmatpush3.bf16.msra.mxu0 %v873_v60 }
 0x40d   : > { %1217 = vmatmul.mubr.msk.bf16.vlgmr.msra.gmra.mrb[12].mxu0 %vm586_vm1, %v1300_v0 }
 0x4e0   : > { %v1218_v2 = vpop.f32.mrb[12].mxu0 }
 0x4e1   : > { %v961_v3 = vadd.f32 %v1218_v2, %v895_v63  ;;  %v952_v4 = vpop.f32.mrb[13].mxu0 }
 0x4e2   : > { %v953_v7 = vadd.f32 %v952_v4, %v885_v1  ;;  %v1219_v8 = vpop.f32.mrb[14].mxu0 }
 0x4e3   : > { %969 = vst [vmem:[%s284_s8 + $0x10] sm:$0xff] %v961_v3  ;;  %v964_v9 = vadd.f32 %v1219_v8, %v900_v6  ;;  %v955_v10 = vpop.f32.mrb[15].mxu0 }
 0x4e4   : > { %967 = vst [vmem:[%s284_s8] sm:$0xff] %v953_v7  ;;  %v956_v11 = vadd.f32 %v955_v10, %v890_v5 }
 0x4e5   : > { %970 = vst [vmem:[%s284_s8 + $0x18] sm:$0xff] %v964_v9 }
 0x4e6   : > { %968 = vst [vmem:[%s284_s8 + $0x8] sm:$0xff] %v956_v11 }
 0x4e7   : > { %1406 = shalt.err (!%p1403_p7)
}
 0x4e8   : > { %s1407_s26 = scalar_lea.hbm %s1863_s19, 512  ;;  %s1411_s11 = scalar_lea.hbm %s1913_s6, 1024 }
 0x4e9   : > { %p1408_p9 = scmp.ne.s32.totalorder %s1863_s19, %s1407_s26  ;;  %p1412_p5 = scmp.lt.u32.totalorder %s1863_s19, %s1913_s6 }
 0x4ea   : > { %p1413_p2 = scmp.lt.u32.totalorder %s1411_s11, %s1407_s26  ;;  %p1415_p4 = scmp.lt.u32.totalorder %s1407_s26, %s1863_s19 }
 0x4eb   : > { %p1409_p1 = pnand %p1408_p9, %p1602_p12 }
 0x4ec   : > { %p1414_p13 = por %p1413_p2, %p1412_p5 }
 0x4ed   : > { %p1410_p0 = pneg %p1409_p1 }
 0x4ee   : > { %p1416_p6 = por %p1415_p4, %p1414_p13 }
 0x4f0   : > { %p1417_p8 = pnand %p1416_p6, %p1410_p0 }
 0x4f2   : > { %1420 = shalt.err (!%p1417_p8)
}
 0x4f3   : > { %s1471_s17 = smov 128   ;;  %s1472_s10 = smov 8  }
 0x4f4   : > { %1229 = dma.vmem_to_hbm [thread:$0]  (%p1602_p12), %s1858_s27, 512, %s1863_s19, %s972_s25, %s1471_s17, %s1471_s17, %s1472_s10  }
 0x4f5 PF: > { %s1000_s30 = sand.u32 1, %s1451_s21   ;;  %p1932_p10 = scmp.ne.s32.totalorder %s1920_s28, 0 }
 0x4f6   : > { %p1933_p11 = scmp.ge.s32.totalorder %s1463_s24, 2  ;;  %s1001_s16 = scalar_lea.sflag [#allocation4], %s1000_s30 }
 0x4f8   : > { %p1240_p3 = pnand %p1933_p11, %p1932_p10 }
 0x4fa   : > { %1446 = dma.done.wait (!%p1240_p3), %s1001_s16, 512  }
 0x4fb   : > { %1448 = vsyncadd (!%p1240_p3), %s1001_s16, 4294966784  ;;  %p20_p7 = scmp.ge.s32.totalorder %s1564_s9, 4   ;;  %s1934_s21 = smov %s1455_s22 }
 0x4fc   : > { %s1935_s22 = smov %s1459_s23  ;;  %s1936_s23 = smov %s1598_s13 }
 0x4fd   : > { %s1937_s24 = smov %s1564_s9  ;;  %22 = sbr.rel (!%p20_p7) target bundleno = 6 (0x6), region = 93 }
 0x504   :  { %1006 = vsyncpa [#allocation3], 1 }
 0x505   :  { %1008 = vsyncpa [#allocation3 + $0x1], 1 }
 0x506   :  { %1009 = vsyncpa [#allocation6], 1 }
 0x507   :  { %1010 = vsyncpa [#allocation4], 1 }
 0x508   :  { %1012 = vsyncpa [#allocation4 + $0x1], 1 }

</bundles_post_ra>
